<compile_context>
chip_gen: v7x
topology: tpu7x:2x2x1
jax: 0.10.0
libtpu: 0.0.40
codegen_flags: <defaults>
</compile_context>

<pallas_src>
import numpy as np
import jax
import jax.numpy as jnp
from jax.experimental import pallas as pl
from jax.experimental.pallas import tpu as pltpu


def _identity_kernel(x_ref, o_ref):
    # TODO(synk): reference forward() raises NotImplementedError; a real
    # state_dim -> action_dim head (bf16 jnp.dot on the MXU with a resident,
    # lane-padded (K,N -> 128) weight block and an f32 VMEM accumulator) would
    # replace this elementwise copy.
    o_ref[...] = x_ref[...]


def _sublane_multiple(dtype):
    itemsize = jnp.dtype(dtype).itemsize
    if itemsize >= 4:
        return 8      # f32
    if itemsize == 2:
        return 16     # bf16 packs 2 rows per sublane
    return 32         # int8 / fp8


def _choose_row_tile(n_rows, feature, dtype):
    sub = _sublane_multiple(dtype)
    itemsize = jnp.dtype(dtype).itemsize
    # ~2 MiB per VMEM buffer; x2 (in + out) x2 (double buffer) ~ 8 MiB / step:
    # under v5e's 16 MiB scoped-VMEM default and well under v7x's 64 MiB VMEM.
    budget_bytes = 2 * 1024 * 1024
    rows = budget_bytes // max(1, feature * itemsize)
    rows = max(sub, (rows // sub) * sub)
    if rows >= n_rows:
        return n_rows          # full extent: always a legal block shape
    return rows


def _identity_pallas(x):
    """Batch-tiled, pipelined pass-through (scaffold for a future head)."""
    if x.ndim == 0 or x.size == 0:
        # Degenerate shapes can't be expressed as a TPU block; identity anyway.
        return x

    orig_shape = x.shape
    feature = orig_shape[-1]
    n_rows = x.size // feature
    x2d = x.reshape(n_rows, feature)   # contiguous collapse, no data movement

    row_tile = _choose_row_tile(n_rows, feature, x.dtype)
    grid = (pl.cdiv(n_rows, row_tile),)

    out = pl.pallas_call(
        _identity_kernel,
        out_shape=jax.ShapeDtypeStruct((n_rows, feature), x.dtype),
        grid=grid,
        in_specs=[pl.BlockSpec((row_tile, feature), lambda i: (i, 0))],
        out_specs=pl.BlockSpec((row_tile, feature), lambda i: (i, 0)),
        compiler_params=pltpu.CompilerParams(
            dimension_semantics=("parallel",),   # megacore-sharded on v7x
            vmem_limit_bytes=32 * 1024 * 1024,
        ),
    )(x2d)
    return out.reshape(orig_shape)


def network_forward(x, *, force_kernel=False):
    """Forward pass of the (unimplemented) Network module.

    Semantically a pass-through: by default short-circuits and returns x
    (zero HBM traffic).  `force_kernel=True` routes through the batch-tiled
    Pallas scaffold that a real state_dim -> action_dim head would replace.
    """
    if not force_kernel:
        return x
    return _identity_pallas(x)


class Network:
    """JAX-side mirror of the PyTorch module (no parameters defined)."""

    def __init__(self, state_dim, action_dim):
        self._state_dim = state_dim
        self._action_dim = action_dim  # unused by the reference module as well

    def forward(self, x, *, force_kernel=False):
        return network_forward(x, force_kernel=force_kernel)


if __name__ == "__main__":
    key = jax.random.PRNGKey(0)
    batch, state_dim, action_dim = 8, 32, 4

    x = jax.random.normal(key, (batch, state_dim), dtype=jnp.float32)
    x_host = np.asarray(x)

    net = Network(state_dim, action_dim)

    # Default (short-circuit) path: free identity.
    out_fast = net.forward(x)
    assert out_fast.shape == (batch, state_dim)
    assert np.allclose(np.asarray(out_fast), x_host)

    # Exercise the Pallas scaffold once and block on the result.
    out_kernel = jax.block_until_ready(net.forward(x, force_kernel=True))
    assert out_kernel.shape == (batch, state_dim)
    assert np.allclose(np.asarray(out_kernel), x_host)

    print("KERNEL_OK")
</pallas_src>

<mosaic_0001>
module attributes {stable_mosaic.version = 11 : i64} {
  func.func @_identity_kernel(%arg0: i32, %arg1: memref<8x32xf32, #tpu.memory_space<vmem>>, %arg2: memref<8x32xf32, #tpu.memory_space<vmem>>) attributes {dimension_semantics = [#tpu.dimension_semantics<parallel>], iteration_bounds = array<i64: 1>, scalar_prefetch = 0 : i64, scratch_operands = 0 : i64, tpu.core_type = #tpu.core_type<tc>, window_params = [{transform_indices = @transform_0, window_bounds = array<i64: 8, 32>}, {transform_indices = @transform_1, window_bounds = array<i64: 8, 32>}]} {
    %c0 = arith.constant 0 : index
    %c0_0 = arith.constant 0 : index
    %0 = vector.load %arg1[%c0, %c0_0] : memref<8x32xf32, #tpu.memory_space<vmem>>, vector<8x32xf32>
    %c0_1 = arith.constant 0 : index
    %c0_2 = arith.constant 0 : index
    %1 = vector.load %arg2[%c0_1, %c0_2] : memref<8x32xf32, #tpu.memory_space<vmem>>, vector<8x32xf32>
    tpu.vector_store %arg2[%c0_1, %c0_2], %0 {strides = array<i32>} : memref<8x32xf32, #tpu.memory_space<vmem>>, vector<8x32xf32>,
    return
  }
  func.func @transform_0(%arg0: i32) -> (i32, i32) {
    %c0_i32 = arith.constant 0 : i32
    %c0_i32_0 = arith.constant 0 : i32
    return %arg0, %c0_i32 : i32, i32
  }
  func.func @transform_1(%arg0: i32) -> (i32, i32) {
    %c0_i32 = arith.constant 0 : i32
    %c0_i32_0 = arith.constant 0 : i32
    return %arg0, %c0_i32 : i32, i32
  }
}

</mosaic_0001>

<bundles_post_ra>
// kernel: tpu_custom_call.1
= control target key start
LH: loop header
LB: loop body
LE: loop exit
PB: predicated region body
PF: predicated region fallthrough
CT: control target
= control target key end

     0   :  { %6 = vsyncpa [#allocation3], 0  ;;  %s125_s0 = inlined_call_operand.hbm [shape: f32[8,32], index: 0, kind: input, shape index: {}]   ;;  %s126_s1 = inlined_call_operand.hbm [shape: f32[8,32], index: 1, kind: output, shape index: {}]  }
   0x1   :  { %7 = vsyncpa [#allocation4], 0  ;;  %s89_s6 = smov [#allocation2]   ;;  %s41_s10 = scalar_lea.hbm %s125_s0, 128 }
   0x2   :  { %s14_s7 = sshll.u32 %s89_s6, 4  ;;  %p42_p0 = scmp.ne.s32.totalorder %s125_s0, %s41_s10  ;;  %s15_s7 = int_to_ptr.vmem [resolvable:$true] %s14_s7 }
   0x3   :  { %p45_p1 = scmp.lt.u32.totalorder %s41_s10, %s125_s0 }
   0x5   :  { %p47_p2 = pnand %p45_p1, %p42_p0 }
   0x7   :  { %50 = shalt.err (!%p47_p2)
}
   0x8   :  { %s51_s15 = scalar_lea.vmem %s15_s7, 128  ;;  %p56_p4 = scmp.lt.s32.totalorder %s15_s7, %s15_s7 }
   0x9   :  { %p52_p3 = scmp.ne.s32.totalorder %s15_s7, %s51_s15  ;;  %p57_p5 = scmp.lt.s32.totalorder %s51_s15, %s51_s15 }
   0xb   :  { %p58_p6 = por %p57_p5, %p56_p4 }
   0xd   :  { %p59_p7 = pnand %p58_p6, %p52_p3 }
   0xf   :  { %62 = shalt.err (!%p59_p7)
}
  0x10   :  { %17 = dma.hbm_to_vmem [thread:$0]  %s125_s0, 128, %s15_s7, [#allocation3]  }
  0x11   :  { %85 = dma.done.wait [#allocation3], 128  }
  0x12   :  { %86 = vsyncadd [#allocation3], 4294967168  ;;  %s90_s18 = smov [#allocation5]   ;;  %vm22_vm0 = vcmask 261120   ;;  %v21_v0 = vld [vmem:[#allocation2] sm:$0xff] }
  0x13   :  { %s30_s19 = sshll.u32 %s90_s18, 4  ;;  %23 = vst.msk [vmem:[#allocation5] sm:$0xff] %vm22_vm0, %v21_v0  ;;  %s31_s19 = int_to_ptr.vmem [resolvable:$true] %s30_s19 }
  0x14   :  { %s63_s20 = scalar_lea.vmem %s31_s19, 128  ;;  %p68_p9 = scmp.lt.s32.totalorder %s31_s19, %s31_s19 }
  0x15   :  { %p64_p8 = scmp.ne.s32.totalorder %s31_s19, %s63_s20  ;;  %p69_p10 = scmp.lt.s32.totalorder %s63_s20, %s63_s20 }
  0x17   :  { %p70_p11 = por %p69_p10, %p68_p9 }
  0x19   :  { %p71_p12 = pnand %p70_p11, %p64_p8 }
  0x1b   :  { %74 = shalt.err (!%p71_p12)
}
  0x1c   :  { %s75_s23 = scalar_lea.hbm %s126_s1, 128 }
  0x1d   :  { %p76_p13 = scmp.ne.s32.totalorder %s126_s1, %s75_s23  ;;  %p79_p0 = scmp.lt.u32.totalorder %s75_s23, %s126_s1 }
  0x1f   :  { %p81_p1 = pnand %p79_p0, %p76_p13 }
  0x21   :  { %84 = shalt.err (!%p81_p1)
}
  0x22   :  { %33 = dma.vmem_to_hbm [thread:$0]  %s31_s19, 128, %s126_s1, [#allocation4]  }
  0x23   :  { %87 = dma.done.wait [#allocation4], 128  }
  0x24   :  { %88 = vsyncadd [#allocation4], 4294967168 }
  0x25   :  { %37 = vsyncpa [#allocation3], 1 }
  0x26   :  { %38 = vsyncpa [#allocation4], 1 }

</bundles_post_ra>
